<compile_context>
chip_gen: v6e
topology: v6e:2x2x1
jax: 0.10.0
libtpu: 0.0.40
codegen_flags: <defaults>
</compile_context>

<pallas_src>
import functools

import numpy as np
import jax
import jax.numpy as jnp
from jax import lax
from jax.experimental import pallas as pl
from jax.experimental.pallas import tpu as pltpu

C = 40          # input channel count fixed by the module (Conv2d(40, ...))


def tiansi_coeffs(v):
    """(a1, a2) coefficients of the 5x5 Tiansi operator; center weight is 8*a0=8."""
    return -v, (v * v - v) / 2.0


def tiansi_kernel(v):
    """Full 5x5 Tiansi filter (used only by the reference implementation)."""
    a1, a2 = tiansi_coeffs(v)
    return np.array(
        [[a2, 0.0, a2, 0.0, a2],
         [0.0, a1, a1, a1, 0.0],
         [a2, a1, 8.0, a1, a2],
         [0.0, a1, a1, a1, 0.0],
         [a2, 0.0, a2, 0.0, a2]], dtype=np.float32)


K5 = tiansi_kernel(0.5)
K6 = tiansi_kernel(0.6)
A1_5, A2_5 = (float(c) for c in tiansi_coeffs(0.5))
A1_6, A2_6 = (float(c) for c in tiansi_coeffs(0.6))


def _frac_kernel(pos_ref, x_ref, o_ref, *, W):
    """One (batch, channel-tile) block, spatial plane flattened onto lanes.

    pos_ref: (2, H*W) int32 -- row 0: flat index p, row 1: column index w = p % W
    x_ref  : (1, TC, H*W)   -- input block (channels on sublanes, H*W on lanes)
    o_ref  : (1, 3, TC, H*W)-- output block: [conv(v=0.5), conv(v=0.6), x]
    """
    HW = x_ref.shape[-1]
    x = x_ref[0].astype(jnp.float32)       # in-kernel upcast; no wrapper astype pass
    p = pos_ref[0:1, :]                    # (1, HW) flat spatial index
    wc = pos_ref[1:2, :]                   # (1, HW) column index (p % W)

    def shifted(arr, s, valid):
        # y[p] = arr[p + s] where `valid` (zero-padded conv boundary), else 0.
        # `s` is a static Python int; mask broadcasts (1,HW) over channels.
        y = pltpu.roll(arr, shift=(-s) % HW, axis=1)
        return jnp.where(valid, y, 0.0)

    # Identity channel straight from the aligned input (no padded scratch).
    o_ref[0, 2] = x.astype(o_ref.dtype)

    # Shared partial sums: both Tiansi filters are
    #   8*x + a1*(stride-1 3x3 box sum - x) + a2*(stride-2 3x3 box sum - x).
    # Column shifts first, then reused for both row shifts: 8 rolls total.
    r1 = x + shifted(x, -1, wc >= 1) + shifted(x, 1, wc <= W - 2)
    s_edge = (r1 + shifted(r1, -W, p >= W) + shifted(r1, W, p < HW - W)) - x

    r2 = x + shifted(x, -2, wc >= 2) + shifted(x, 2, wc <= W - 3)
    s_corner = (r2 + shifted(r2, -2 * W, p >= 2 * W)
                   + shifted(r2, 2 * W, p < HW - 2 * W)) - x

    base = 8.0 * x
    o_ref[0, 0] = (base + A1_5 * s_edge + A2_5 * s_corner).astype(o_ref.dtype)
    o_ref[0, 1] = (base + A1_6 * s_edge + A2_6 * s_corner).astype(o_ref.dtype)


def frac_enhancer(x_nchw, *, tc=None):
    """Pallas implementation of FracEnhancer.forward. Input/output are NCHW."""
    N, c_in, H, W = x_nchw.shape
    assert c_in == C, f"FracEnhancer expects {C} input channels, got {c_in}"
    HW = H * W

    if tc is None:
        # Coarse tiles (whole channel dim) unless that would leave a single grid
        # step -- keep >=2 parallel blocks so both v7x TensorCores get work.
        tc = c_in if N >= 2 else (8 if c_in % 8 == 0 else c_in)
    assert c_in % tc == 0 and (tc % 8 == 0 or tc == c_in), (c_in, tc)

    # Free contiguous reshape: spatial plane flattened onto lanes.
    x = x_nchw.reshape(N, c_in, HW)

    # Precomputed flat / column indices for boundary masking (avoids in-kernel mod).
    pidx = np.arange(HW, dtype=np.int32)
    pos = jnp.asarray(np.stack([pidx, pidx % W]))          # (2, HW) int32

    # VMEM budget: double-buffered input + 3x output tiles plus headroom, kept
    # well under v7x's 64 MiB physical (32 MiB scoped) VMEM.
    itemsize = x_nchw.dtype.itemsize
    tile_bytes = tc * HW * itemsize * (1 + 3)
    vmem_limit = int(min(4 * tile_bytes + (16 << 20), 32 << 20))

    kernel = functools.partial(_frac_kernel, W=W)
    out = pl.pallas_call(
        kernel,
        out_shape=jax.ShapeDtypeStruct((N, 3, c_in, HW), x_nchw.dtype),
        grid=(N, c_in // tc),
        in_specs=[pl.BlockSpec((2, HW), lambda n, c: (0, 0)),
                  pl.BlockSpec((1, tc, HW), lambda n, c: (n, c, 0))],
        out_specs=pl.BlockSpec((1, 3, tc, HW), lambda n, c: (n, 0, c, 0)),
        compiler_params=pltpu.CompilerParams(
            dimension_semantics=("parallel", "parallel"),
            vmem_limit_bytes=vmem_limit),
    )(pos, x)
    # (N, 3, C, H*W) -> (N, 3C, H, W): free contiguous reshape reproducing
    # torch.cat([out_five, out_six, x], dim=1) exactly.
    return out.reshape(N, 3 * c_in, H, W)


def frac_enhancer_reference(x_nchw):
    """Pure-JAX reference using a lax depthwise conv, for correctness check."""
    x = x_nchw.astype(jnp.float32)
    _, c_in, _, _ = x.shape

    def dwconv(kern_np):
        rhs = jnp.asarray(kern_np, jnp.float32)[None, None]      # (1, 1, 5, 5)
        rhs = jnp.tile(rhs, (c_in, 1, 1, 1))                     # OIHW, I=1/group
        return lax.conv_general_dilated(
            x, rhs, window_strides=(1, 1), padding="SAME",
            dimension_numbers=("NCHW", "OIHW", "NCHW"),
            feature_group_count=c_in, precision=lax.Precision.HIGHEST)

    return jnp.concatenate([dwconv(K5), dwconv(K6), x], axis=1).astype(x_nchw.dtype)


if __name__ == "__main__":
    key = jax.random.PRNGKey(0)
    # Small shape consistent with the module: batch=2, channels=40, spatial=16.
    x = jax.random.normal(key, (2, 40, 16, 16), dtype=jnp.float32)

    out = jax.block_until_ready(frac_enhancer(x))
    ref = jax.block_until_ready(frac_enhancer_reference(x))

    assert out.shape == (2, 120, 16, 16), out.shape
    np.testing.assert_allclose(np.asarray(out), np.asarray(ref),
                               rtol=1e-5, atol=1e-5)
    print("KERNEL_OK")
</pallas_src>

<mosaic_0001>
module attributes {stable_mosaic.version = 11 : i64} {
  func.func @_frac_kernel(%arg0: i32, %arg1: i32, %arg2: memref<2x256xi32, #tpu.memory_space<vmem>>, %arg3: memref<1x40x256xf32, #tpu.memory_space<vmem>>, %arg4: memref<1x3x40x256xf32, #tpu.memory_space<vmem>>) attributes {dimension_semantics = [#tpu.dimension_semantics<parallel>, #tpu.dimension_semantics<parallel>], iteration_bounds = array<i64: 2, 1>, scalar_prefetch = 0 : i64, scratch_operands = 0 : i64, tpu.core_type = #tpu.core_type<tc>, window_params = [{pipeline_mode = #tpu.pipeline_mode<synchronous>, transform_indices = @transform_0, window_bounds = array<i64: 2, 256>}, {transform_indices = @transform_1, window_bounds = array<i64: 1, 40, 256>}, {transform_indices = @transform_2, window_bounds = array<i64: 1, 3, 40, 256>}]} {
    %c0 = arith.constant 0 : index
    %c0_0 = arith.constant 0 : index
    %c0_1 = arith.constant 0 : index
    %0 = vector.load %arg3[%c0, %c0_0, %c0_1] : memref<1x40x256xf32, #tpu.memory_space<vmem>>, vector<1x40x256xf32>
    %1 = vector.shape_cast %0 : vector<1x40x256xf32> to vector<40x256xf32>
    %c0_2 = arith.constant 0 : index
    %c0_3 = arith.constant 0 : index
    %2 = vector.load %arg2[%c0_2, %c0_3] : memref<2x256xi32, #tpu.memory_space<vmem>>, vector<1x256xi32>
    %c1 = arith.constant 1 : index
    %c0_4 = arith.constant 0 : index
    %3 = vector.load %arg2[%c1, %c0_4] : memref<2x256xi32, #tpu.memory_space<vmem>>, vector<1x256xi32>
    %c0_5 = arith.constant 0 : index
    %c2 = arith.constant 2 : index
    %c0_6 = arith.constant 0 : index
    %c0_7 = arith.constant 0 : index
    %4 = vector.load %arg4[%c0_5, %c2, %c0_6, %c0_7] : memref<1x3x40x256xf32, #tpu.memory_space<vmem>>, vector<1x1x40x256xf32>
    %5 = vector.shape_cast %4 : vector<1x1x40x256xf32> to vector<40x256xf32>
    %6 = vector.shape_cast %1 : vector<40x256xf32> to vector<1x1x40x256xf32>
    tpu.vector_store %arg4[%c0_5, %c2, %c0_6, %c0_7], %6 {strides = array<i32>} : memref<1x3x40x256xf32, #tpu.memory_space<vmem>>, vector<1x1x40x256xf32>,
    %c1_i32 = arith.constant 1 : i32
    %7 = vector.broadcast %c1_i32 : i32 to vector<1x256xi32>
    %8 = arith.cmpi sge, %3, %7 : vector<1x256xi32>
    %c1_i32_8 = arith.constant 1 : i32
    %9 = tpu.dynamic_rotate %1 by %c1_i32_8 dim 1 : vector<40x256xf32>, i32 -> vector<40x256xf32>
    %cst = arith.constant 0.000000e+00 : f32
    %10 = vector.shape_cast %8 : vector<1x256xi1> to vector<1x256xi1>
    %11 = vector.broadcast %10 : vector<1x256xi1> to vector<40x256xi1>
    %12 = vector.broadcast %cst : f32 to vector<40x256xf32>
    %13 = arith.select %11, %9, %12 : vector<40x256xi1>, vector<40x256xf32>
    %14 = arith.addf %1, %13 : vector<40x256xf32>
    %c14_i32 = arith.constant 14 : i32
    %15 = vector.broadcast %c14_i32 : i32 to vector<1x256xi32>
    %16 = arith.cmpi sle, %3, %15 : vector<1x256xi32>
    %c255_i32 = arith.constant 255 : i32
    %17 = tpu.dynamic_rotate %1 by %c255_i32 dim 1 : vector<40x256xf32>, i32 -> vector<40x256xf32>
    %cst_9 = arith.constant 0.000000e+00 : f32
    %18 = vector.shape_cast %16 : vector<1x256xi1> to vector<1x256xi1>
    %19 = vector.broadcast %18 : vector<1x256xi1> to vector<40x256xi1>
    %20 = vector.broadcast %cst_9 : f32 to vector<40x256xf32>
    %21 = arith.select %19, %17, %20 : vector<40x256xi1>, vector<40x256xf32>
    %22 = arith.addf %14, %21 : vector<40x256xf32>
    %c16_i32 = arith.constant 16 : i32
    %23 = vector.broadcast %c16_i32 : i32 to vector<1x256xi32>
    %24 = arith.cmpi sge, %2, %23 : vector<1x256xi32>
    %c16_i32_10 = arith.constant 16 : i32
    %25 = tpu.dynamic_rotate %22 by %c16_i32_10 dim 1 : vector<40x256xf32>, i32 -> vector<40x256xf32>
    %cst_11 = arith.constant 0.000000e+00 : f32
    %26 = vector.shape_cast %24 : vector<1x256xi1> to vector<1x256xi1>
    %27 = vector.broadcast %26 : vector<1x256xi1> to vector<40x256xi1>
    %28 = vector.broadcast %cst_11 : f32 to vector<40x256xf32>
    %29 = arith.select %27, %25, %28 : vector<40x256xi1>, vector<40x256xf32>
    %30 = arith.addf %22, %29 : vector<40x256xf32>
    %c240_i32 = arith.constant 240 : i32
    %31 = vector.broadcast %c240_i32 : i32 to vector<1x256xi32>
    %32 = arith.cmpi slt, %2, %31 : vector<1x256xi32>
    %c240_i32_12 = arith.constant 240 : i32
    %33 = tpu.dynamic_rotate %22 by %c240_i32_12 dim 1 : vector<40x256xf32>, i32 -> vector<40x256xf32>
    %cst_13 = arith.constant 0.000000e+00 : f32
    %34 = vector.shape_cast %32 : vector<1x256xi1> to vector<1x256xi1>
    %35 = vector.broadcast %34 : vector<1x256xi1> to vector<40x256xi1>
    %36 = vector.broadcast %cst_13 : f32 to vector<40x256xf32>
    %37 = arith.select %35, %33, %36 : vector<40x256xi1>, vector<40x256xf32>
    %38 = arith.addf %30, %37 : vector<40x256xf32>
    %39 = arith.subf %38, %1 : vector<40x256xf32>
    %c2_i32 = arith.constant 2 : i32
    %40 = vector.broadcast %c2_i32 : i32 to vector<1x256xi32>
    %41 = arith.cmpi sge, %3, %40 : vector<1x256xi32>
    %c2_i32_14 = arith.constant 2 : i32
    %42 = tpu.dynamic_rotate %1 by %c2_i32_14 dim 1 : vector<40x256xf32>, i32 -> vector<40x256xf32>
    %cst_15 = arith.constant 0.000000e+00 : f32
    %43 = vector.shape_cast %41 : vector<1x256xi1> to vector<1x256xi1>
    %44 = vector.broadcast %43 : vector<1x256xi1> to vector<40x256xi1>
    %45 = vector.broadcast %cst_15 : f32 to vector<40x256xf32>
    %46 = arith.select %44, %42, %45 : vector<40x256xi1>, vector<40x256xf32>
    %47 = arith.addf %1, %46 : vector<40x256xf32>
    %c13_i32 = arith.constant 13 : i32
    %48 = vector.broadcast %c13_i32 : i32 to vector<1x256xi32>
    %49 = arith.cmpi sle, %3, %48 : vector<1x256xi32>
    %c254_i32 = arith.constant 254 : i32
    %50 = tpu.dynamic_rotate %1 by %c254_i32 dim 1 : vector<40x256xf32>, i32 -> vector<40x256xf32>
    %cst_16 = arith.constant 0.000000e+00 : f32
    %51 = vector.shape_cast %49 : vector<1x256xi1> to vector<1x256xi1>
    %52 = vector.broadcast %51 : vector<1x256xi1> to vector<40x256xi1>
    %53 = vector.broadcast %cst_16 : f32 to vector<40x256xf32>
    %54 = arith.select %52, %50, %53 : vector<40x256xi1>, vector<40x256xf32>
    %55 = arith.addf %47, %54 : vector<40x256xf32>
    %c32_i32 = arith.constant 32 : i32
    %56 = vector.broadcast %c32_i32 : i32 to vector<1x256xi32>
    %57 = arith.cmpi sge, %2, %56 : vector<1x256xi32>
    %c32_i32_17 = arith.constant 32 : i32
    %58 = tpu.dynamic_rotate %55 by %c32_i32_17 dim 1 : vector<40x256xf32>, i32 -> vector<40x256xf32>
    %cst_18 = arith.constant 0.000000e+00 : f32
    %59 = vector.shape_cast %57 : vector<1x256xi1> to vector<1x256xi1>
    %60 = vector.broadcast %59 : vector<1x256xi1> to vector<40x256xi1>
    %61 = vector.broadcast %cst_18 : f32 to vector<40x256xf32>
    %62 = arith.select %60, %58, %61 : vector<40x256xi1>, vector<40x256xf32>
    %63 = arith.addf %55, %62 : vector<40x256xf32>
    %c224_i32 = arith.constant 224 : i32
    %64 = vector.broadcast %c224_i32 : i32 to vector<1x256xi32>
    %65 = arith.cmpi slt, %2, %64 : vector<1x256xi32>
    %c224_i32_19 = arith.constant 224 : i32
    %66 = tpu.dynamic_rotate %55 by %c224_i32_19 dim 1 : vector<40x256xf32>, i32 -> vector<40x256xf32>
    %cst_20 = arith.constant 0.000000e+00 : f32
    %67 = vector.shape_cast %65 : vector<1x256xi1> to vector<1x256xi1>
    %68 = vector.broadcast %67 : vector<1x256xi1> to vector<40x256xi1>
    %69 = vector.broadcast %cst_20 : f32 to vector<40x256xf32>
    %70 = arith.select %68, %66, %69 : vector<40x256xi1>, vector<40x256xf32>
    %71 = arith.addf %63, %70 : vector<40x256xf32>
    %72 = arith.subf %71, %1 : vector<40x256xf32>
    %cst_21 = arith.constant 8.000000e+00 : f32
    %73 = vector.broadcast %cst_21 : f32 to vector<40x256xf32>
    %74 = arith.mulf %73, %1 : vector<40x256xf32>
    %cst_22 = arith.constant -5.000000e-01 : f32
    %75 = vector.broadcast %cst_22 : f32 to vector<40x256xf32>
    %76 = arith.mulf %75, %39 : vector<40x256xf32>
    %77 = arith.addf %74, %76 : vector<40x256xf32>
    %cst_23 = arith.constant -1.250000e-01 : f32
    %78 = vector.broadcast %cst_23 : f32 to vector<40x256xf32>
    %79 = arith.mulf %78, %72 : vector<40x256xf32>
    %80 = arith.addf %77, %79 : vector<40x256xf32>
    %c0_24 = arith.constant 0 : index
    %c0_25 = arith.constant 0 : index
    %c0_26 = arith.constant 0 : index
    %c0_27 = arith.constant 0 : index
    %81 = vector.load %arg4[%c0_24, %c0_25, %c0_26, %c0_27] : memref<1x3x40x256xf32, #tpu.memory_space<vmem>>, vector<1x1x40x256xf32>
    %82 = vector.shape_cast %81 : vector<1x1x40x256xf32> to vector<40x256xf32>
    %83 = vector.shape_cast %80 : vector<40x256xf32> to vector<1x1x40x256xf32>
    tpu.vector_store %arg4[%c0_24, %c0_25, %c0_26, %c0_27], %83 {strides = array<i32>} : memref<1x3x40x256xf32, #tpu.memory_space<vmem>>, vector<1x1x40x256xf32>,
    %cst_28 = arith.constant -6.000000e-01 : f32
    %84 = vector.broadcast %cst_28 : f32 to vector<40x256xf32>
    %85 = arith.mulf %84, %39 : vector<40x256xf32>
    %86 = arith.addf %74, %85 : vector<40x256xf32>
    %cst_29 = arith.constant -1.200000e-01 : f32
    %87 = vector.broadcast %cst_29 : f32 to vector<40x256xf32>
    %88 = arith.mulf %87, %72 : vector<40x256xf32>
    %89 = arith.addf %86, %88 : vector<40x256xf32>
    %c0_30 = arith.constant 0 : index
    %c1_31 = arith.constant 1 : index
    %c0_32 = arith.constant 0 : index
    %c0_33 = arith.constant 0 : index
    %90 = vector.load %arg4[%c0_30, %c1_31, %c0_32, %c0_33] : memref<1x3x40x256xf32, #tpu.memory_space<vmem>>, vector<1x1x40x256xf32>
    %91 = vector.shape_cast %90 : vector<1x1x40x256xf32> to vector<40x256xf32>
    %92 = vector.shape_cast %89 : vector<40x256xf32> to vector<1x1x40x256xf32>
    tpu.vector_store %arg4[%c0_30, %c1_31, %c0_32, %c0_33], %92 {strides = array<i32>} : memref<1x3x40x256xf32, #tpu.memory_space<vmem>>, vector<1x1x40x256xf32>,
    return
  }
  func.func @transform_0(%arg0: i32, %arg1: i32) -> (i32, i32) {
    %c0_i32 = arith.constant 0 : i32
    %c0_i32_0 = arith.constant 0 : i32
    %c0_i32_1 = arith.constant 0 : i32
    return %c0_i32, %c0_i32_0 : i32, i32
  }
  func.func @transform_1(%arg0: i32, %arg1: i32) -> (i32, i32, i32) {
    %c0_i32 = arith.constant 0 : i32
    %c0_i32_0 = arith.constant 0 : i32
    return %arg0, %arg1, %c0_i32 : i32, i32, i32
  }
  func.func @transform_2(%arg0: i32, %arg1: i32) -> (i32, i32, i32, i32) {
    %c0_i32 = arith.constant 0 : i32
    %c0_i32_0 = arith.constant 0 : i32
    %c0_i32_1 = arith.constant 0 : i32
    return %arg0, %c0_i32, %arg1, %c0_i32_0 : i32, i32, i32, i32
  }
}

</mosaic_0001>

<bundles_post_ra>
// kernel: tpu_custom_call.1
= control target key start
LH: loop header
LB: loop body
LE: loop exit
PB: predicated region body
PF: predicated region fallthrough
CT: control target
= control target key end

     0   :  { %7 = vsyncpa [#allocation3], 0  ;;  %s2447_s0 = inlined_call_operand.hbm [shape: s32[2,256], index: 0, kind: input, shape index: {}]   ;;  %s2448_s1 = inlined_call_operand.hbm [shape: f32[2,40,256], index: 1, kind: input, shape index: {}]   ;;  %s2449_s2 = inlined_call_operand.hbm [shape: f32[2,3,40,256], index: 2, kind: output, shape index: {}]  }
   0x1   :  { %8 = vsyncpa [#allocation6], 0 }
   0x2   :  { %10 = vsyncpa [#allocation6 + $0x1], 0 }
   0x3   :  { %11 = vsyncpa [#allocation4], 0 }
   0x4   :  { %13 = vsyncpa [#allocation4 + $0x1], 0  ;;  %s1273_s9 = smov 0   ;;  %s1275_s10 = smov 0  }
   0x5   :  { %s1277_s11 = smov 0   ;;  %s1279_s12 = smov 0  }
   0x6   :  { %s1281_s13 = smov 0   ;;  %s1283_s14 = smov 0  }
   0x7 LB: > { %s973_s15 = sadd.s32 4294967295, %s1241_s14   ;;  %s974_s16 = sadd.s32 4294967294, %s1241_s14   ;;  %s1241_s14 = sphi %s1283_s14, %s19_s14   ;;  %s1237_s13 = sphi %s1281_s13, %s2542_s13   ;;  %s1233_s12 = sphi %s1279_s12, %s2541_s12   ;;  %s1229_s11 = sphi %s1277_s11, %s2540_s11   ;;  %s1225_s10 = sphi %s1275_s10, %s2539_s10   ;;  %s1221_s9 = sphi %s1273_s9, %s2538_s9  }
   0x8   : > { %s61_s17 = sadd.s32 1, %s1229_s11  ;;  %p68_p0 = scmp.ne.s32.totalorder %s1229_s11, %s1225_s10 }
   0x9   : > { %p69_p1 = scmp.eq.s32.totalorder %s1241_s14, 0  ;;  %p74_p2 = scmp.ne.s32.totalorder %s1225_s10, %s1221_s9 }
   0xa   : > { %p1311_p3 = scmp.eq.s32.totalorder %s973_s15, 0  ;;  %p100_p4 = scmp.eq.s32.totalorder %s973_s15, 1 }
   0xb   : > { %p1315_p5 = por %p69_p1, %p68_p0  ;;  %p106_p6 = scmp.eq.s32.totalorder %s974_s16, 1 }
   0xc   : > { %p1321_p7 = por %p1311_p3, %p74_p2  ;;  %p1325_p8 = por %p100_p4, %p68_p0 }
   0xd   : > { %p1329_p9 = por %p106_p6, %p74_p2  ;;  %p975_p10 = scmp.ge.s32.totalorder %s1241_s14, 1 }
   0xe   : > { %s2469_s20 = scalar_select %p1321_p7, 1, 0 }
   0xf   : > { %s2470_s21 = scalar_select %p1325_p8, 1, 0 }
  0x10   : > { %s2471_s22 = scalar_select %p1329_p9, 1, 0 }
  0x11   : > { %p113_p11 = scmp.lt.s32.totalorder %s1241_s14, 3  ;;  %s1243_s24 = smov [#allocation2]  }
  0x12   : > { %s126_s25 = sshll.u32 %s1243_s24, 4  ;;  %p1030_p1 = scmp.lt.s32.totalorder %s1241_s14, 2  ;;  %s127_s25 = int_to_ptr.vmem [resolvable:$true] %s126_s25 }
  0x13   : > { %p1336_p13 = pnand %p975_p10, %p113_p11  ;;  %s31_s28 = sadd.s32 1, %s1237_s13 }
  0x14   : > { %p1345_p4 = pnand %p1030_p1, %p1315_p5  ;;  %p33_p6 = scmp.ge.s32.totalorder %s31_s28, 2 }
  0x15   : > { %p1017_p0 = pneg %p1336_p13  ;;  %s137_s29 = sand.u32 1, %s1229_s11  }
  0x16   : > { %s1114_s30 = scalar_lea.vmem %s127_s25, 64  ;;  %p1122_p8 = scmp.lt.s32.totalorder %s127_s25, %s127_s25 }
  0x17   : > { %p1351_p2 = pnand %p1017_p0, %p1311_p3  ;;  %p1115_p11 = scmp.ne.s32.totalorder %s127_s25, %s1114_s30 }
  0x18   : > { %p1123_p5 = scmp.lt.s32.totalorder %s1114_s30, %s1114_s30 }
  0x19   : > { %p1105_p10 = pneg %p1351_p2 }
  0x1a   : > { %p1124_p1 = por %p1123_p5, %p1122_p8 }
  0x1b   : > { %p1117_p12 = pnand %p1115_p11, %p1105_p10 }
  0x1d   : > { %p1118_p9 = pneg %p1117_p12 }
  0x1f   : > { %p1125_p7 = pnand %p1124_p1, %p1118_p9 }
  0x21   : > { %1128 = shalt.err (!%p1125_p7)
}
  0x22   : > { %1020 = dma.hbm_to_vmem [thread:$0]  (!%p1351_p2), %s2447_s0, 64, %s127_s25, [#allocation3]  }
  0x23   : > { %s2544_s28 = smov (%p33_p6, %s31_s28), 0  ;;  %s1004_s5 = smul.u32 80, %s137_s29 }
  0x24   : > { %s56_s6 = ssub.s32 %s1237_s13, %s2544_s28  ;;  %s1005_s7 = smul.u32 1280, %s1237_s13 }
  0x25   : > { %p59_p8 = scmp.eq.s32.totalorder %s56_s6, 0  ;;  %s141_s19 = scalar_lea.vmem [#allocation5], %s1004_s5 }
  0x26   : > { %s150_s16 = scalar_lea.hbm %s2448_s1, %s1005_s7  ;;  %s151_s24 = sshll.u32 %s141_s19, 4  ;;  %s152_s24 = int_to_ptr.vmem [resolvable:$true] %s151_s24 }
  0x27   : > { %s1375_s27 = scalar_select %p59_p8, %s1229_s11, %s61_s17  }
  0x28   : > { %s138_s30 = scalar_lea.sflag [#allocation6], %s137_s29  ;;  %p1131_p7 = pneg %p1345_p4 }
  0x29   : > { %s1142_s25 = scalar_lea.vmem %s152_s24, 1280  ;;  %s1244_s3 = smov [#allocation5]  }
  0x2a   : > { %p1143_p9 = scmp.ne.s32.totalorder %s152_s24, %s1142_s25  ;;  %s1147_s4 = sshll.u32 %s1244_s3, 4  ;;  %s1148_s4 = int_to_ptr.vmem [resolvable:$false] %s1147_s4 }
  0x2b   : > { %s1149_s6 = scalar_lea.vmem %s1148_s4, 2560  ;;  %p1150_p2 = scmp.lt.s32.totalorder %s152_s24, %s1148_s4 }
  0x2c   : > { %p1145_p12 = pnand %p1143_p9, %p1131_p7  ;;  %p1151_p6 = scmp.lt.s32.totalorder %s1149_s6, %s1142_s25 }
  0x2e   : > { %p1146_p0 = pneg %p1145_p12  ;;  %p1152_p10 = por %p1151_p6, %p1150_p2 }
  0x30   : > { %p1153_p11 = pnand %p1152_p10, %p1146_p0 }
  0x32   : > { %1156 = shalt.err (!%p1153_p11)
}
  0x33   : > { %s1245_s5 = smov 256   ;;  %s1246_s17 = smov 16  }
  0x34   : > { %1024 = dma.hbm_to_vmem [thread:$0]  (!%p1345_p4), %s150_s16, 1280, %s152_s24, %s138_s30, %s1245_s5, %s1245_s5, %s1246_s17  }
  0x35   : > { %163 = sbr.rel (%p1336_p13) target bundleno = 441 (0x1b9), region = 28 }
  0x3a   : > { %1208 = dma.done.wait (%p1311_p3), [#allocation3], 64  }
  0x3b   : > { %1210 = vsyncadd (%p1311_p3), [#allocation3], 4294967232  ;;  %s1388_s29 = sand.u32 1, %s1225_s10   ;;  %p2475_p5 = scmp.ne.s32.totalorder %s2469_s20, 0 }
  0x3c   : > { %s1006_s7 = smul.u32 80, %s1388_s29  ;;  %s170_s8 = scalar_lea.sflag [#allocation6], %s1388_s29 }
  0x3e   : > { %s173_s15 = scalar_lea.vmem [#allocation5], %s1006_s7 }
  0x3f   : > { %1212 = dma.done.wait (%p2475_p5), %s170_s8, 1280  }
  0x40   : > { %1214 = vsyncadd (%p2475_p5), %s170_s8, 4294966016  ;;  %s1007_s23 = smul.u32 240, %s1388_s29  ;;  %v1397_v0 = vld [vmem:[%s173_s15 + $0x20] sm:$0xff]  ;;  %v1401_v2 = vld [vmem:[%s173_s15 + $0x30] sm:$0xff]  ;;  %s1247_s18 = smov 1   ;;  %v241_v14 = vlaneseq  ;;  %v2452_v23 = vmov 0  }
  0x41   : > { %v1399_v1 = vld [vmem:[%s173_s15] sm:$0xff]  ;;  %225 = vrot.lane.b32.xlu1 %v1397_v0, %s1247_s18  ;;  %v1413_v3 = vld [vmem:[%s173_s15 + $0x10] sm:$0xff]  ;;  %v1415_v4 = vld [vmem:[%s173_s15 + $0x8] sm:$0xff]  ;;  %s1248_s20 = smov 127   ;;  %s1249_s16 = smov 2  }
  0x42   : > { %s1404_s26 = scalar_lea.vmem [#allocation7], %s1007_s23  ;;  %221 = vrot.lane.b32.xlu0 %v1399_v1, %s1247_s18  ;;  %v1421_v5 = vld [vmem:[%s173_s15 + $0x40] sm:$0xff]  ;;  %v1423_v6 = vld [vmem:[%s173_s15 + $0x28] sm:$0xff]  ;;  %v1425_v7 = vld [vmem:[%s173_s15 + $0x18] sm:$0xff]  ;;  %s1250_s19 = smov 126   ;;  %v256_v18 = vshrl.u32 %v241_v14, 7 }
  0x43   : > { %985 = vst [vmem:[%s1404_s26 + $0xc0] sm:$0xff] %v1397_v0  ;;  %981 = vst [vmem:[%s1404_s26 + $0xa0] sm:$0xff] %v1399_v1  ;;  %v1433_v8 = vld [vmem:[%s173_s15 + $0x48] sm:$0xff]  ;;  %v1435_v9 = vld [vmem:[%s173_s15 + $0x38] sm:$0xff]  ;;  %v1494_v22 = vand.u32 127, %v241_v14  ;;  %s1252_s24 = smov 16  }
  0x44   : > { %987 = vst [vmem:[%s1404_s26 + $0xd0] sm:$0xff] %v1401_v2  ;;  %983 = vst [vmem:[%s1404_s26 + $0xb0] sm:$0xff] %v1413_v3  ;;  %v1487_v17 = vld [vmem:[#allocation2 + $0x1] ss:$2 sm:$0x3]  ;;  %v1492_v21 = vsub.s32 0, %v256_v18 }
  0x45   : > { %982 = vst [vmem:[%s1404_s26 + $0xa8] sm:$0xff] %v1415_v4  ;;  %989 = vst [vmem:[%s1404_s26 + $0xe0] sm:$0xff] %v1421_v5  ;;  %227 = vrot.lane.b32.xlu1 %v1401_v2, %s1247_s18  ;;  %vm220_vm0 = vcmp.ge.s32.totalorder %v1487_v17, 1  ;;  %vm285_vm1 = vcmp.le.s32.totalorder %v1487_v17, 14  ;;  %vm243_vm2 = vcmp.lt.s32.totalorder %v1494_v22, 1  ;;  %vm306_vm4 = vcmp.lt.s32.totalorder %v1494_v22, 127 }
  0x46   : > { %986 = vst [vmem:[%s1404_s26 + $0xc8] sm:$0xff] %v1423_v6  ;;  %984 = vst [vmem:[%s1404_s26 + $0xb8] sm:$0xff] %v1425_v7  ;;  %223 = vrot.lane.b32.xlu0 %v1413_v3, %s1247_s18  ;;  %v254_v24 = vsel %vm220_vm0, 1, %v2452_v23  ;;  %v317_v30 = vsel %vm285_vm1, 1, %v2452_v23  ;;  %v1528_v40 = vsub.s32 1, %v256_v18  ;;  %vm484_vm8 = vcmp.ge.s32.totalorder %v1487_v17, 2 }
  0x47   : > { %990 = vst [vmem:[%s1404_s26 + $0xe8] sm:$0xff] %v1433_v8  ;;  %988 = vst [vmem:[%s1404_s26 + $0xd8] sm:$0xff] %v1435_v9  ;;  %v258_v27 = vrot.slane %v254_v24, %v1492_v21  ;;  %v321_v33 = vrot.slane %v317_v30, %v1492_v21  ;;  %s1253_s30 = smov 112   ;;  %v516_v31 = vsel %vm484_vm8, 1, %v2452_v23  ;;  %vm547_vm9 = vcmp.le.s32.totalorder %v1487_v17, 13  ;;  %s1254_s25 = smov 32  }
  0x48   : > { %v262_v51 = vrot.slane %v254_v24, %v1528_v40  ;;  %v325_v53 = vrot.slane %v317_v30, %v1528_v40  ;;  %vm505_vm10 = vcmp.lt.s32.totalorder %v1494_v22, 2  ;;  %vm568_vm12 = vcmp.lt.s32.totalorder %v1494_v22, 126  ;;  %s1255_s3 = smov 96   ;;  %s1008_s4 = smul.u32 3840, %s1233_s12 }
  0x49   : > { %231 = vrot.lane.b32.xlu1 %v1415_v4, %s1247_s18  ;;  %vm1505_vm3 = vcmp.eq.s32.totalorder %v258_v27, 1  ;;  %vm1524_vm5 = vcmp.eq.s32.totalorder %v321_v33, 1  ;;  %vm369_vm0 = vcmp.lt.s32.totalorder %v1494_v22, 16  ;;  %s874_s12 = sshll.u32 %s1404_s26, 4  ;;  %s858_s7 = scalar_lea.sflag [#allocation4], %s1388_s29  ;;  %s2394_s12 = int_to_ptr.vmem [resolvable:$true] %s874_s12 }
  0x4a   : > { %229 = vrot.lane.b32.xlu0 %v1421_v5, %s1247_s18  ;;  %vm1576_vm6 = vcmp.eq.s32.totalorder %v262_v51, 1  ;;  %vm1584_vm7 = vcmp.eq.s32.totalorder %v325_v53, 1  ;;  %s2392_s17 = scalar_lea.hbm %s2449_s2, %s1008_s4  ;;  %s1157_s8 = scalar_lea.vmem %s2394_s12, 3840 }
  0x4b   : > { %p1158_p3 = scmp.ne.s32.totalorder %s2394_s12, %s1157_s8  ;;  %p2535_p13 = scmp.ne.s32.totalorder %s2470_s21, 0 }
  0x4c   : > { %s1256_s15 = smov [#allocation7]  }
  0x4d   : > { %235 = vrot.lane.b32.xlu1 %v1423_v6, %s1247_s18  ;;  %p1159_p4 = pnand %p1158_p3, %p2535_p13  ;;  %s1161_s23 = sshll.u32 %s1256_s15, 4  ;;  %s1162_s23 = int_to_ptr.vmem [resolvable:$false] %s1161_s23 }
  0x4e   : > { %233 = vrot.lane.b32.xlu0 %v1425_v7, %s1247_s18  ;;  %p1164_p8 = scmp.lt.s32.totalorder %s2394_s12, %s1162_s23 }
  0x4f   : > { %p1160_p1 = pneg %p1159_p4 }
  0x51   : > { %239 = vrot.lane.b32.xlu1 %v1433_v8, %s1247_s18 }
  0x52   : > { %237 = vrot.lane.b32.xlu0 %v1435_v9, %s1247_s18  ;;  %s1163_s18 = scalar_lea.vmem %s1162_s23, 7680 }
  0x53   : > { %p1165_p7 = scmp.lt.s32.totalorder %s1163_s18, %s1157_s8 }
  0x55   : > { %288 = vrot.lane.b32.xlu1 %v1413_v3, %s1248_s20  ;;  %p1166_p9 = por %p1165_p7, %p1164_p8 }
  0x56   : > { %286 = vrot.lane.b32.xlu0 %v1399_v1, %s1248_s20 }
  0x57   : > { %p1167_p12 = pnand %p1166_p9, %p1160_p1 }
  0x59   : > { %292 = vrot.lane.b32.xlu1 %v1401_v2, %s1248_s20 }
  0x5a   : > { %290 = vrot.lane.b32.xlu0 %v1397_v0, %s1248_s20 }
  0x5d   : > { %296 = vrot.lane.b32.xlu1 %v1415_v4, %s1248_s20 }
  0x5e   : > { %294 = vrot.lane.b32.xlu0 %v1421_v5, %s1248_s20 }
  0x61   : > { %300 = vrot.lane.b32.xlu1 %v1423_v6, %s1248_s20 }
  0x62   : > { %298 = vrot.lane.b32.xlu0 %v1425_v7, %s1248_s20 }
  0x65   : > { %304 = vrot.lane.b32.xlu1 %v1433_v8, %s1248_s20 }
  0x66   : > { %302 = vrot.lane.b32.xlu0 %v1435_v9, %s1248_s20 }
  0x69   : > { %487 = vrot.lane.b32.xlu1 %v1413_v3, %s1249_s16 }
  0x6a   : > { %485 = vrot.lane.b32.xlu0 %v1399_v1, %s1249_s16 }
  0x6d   : > { %491 = vrot.lane.b32.xlu1 %v1401_v2, %s1249_s16 }
  0x6e   : > { %489 = vrot.lane.b32.xlu0 %v1397_v0, %s1249_s16 }
  0x71   : > { %495 = vrot.lane.b32.xlu1 %v1415_v4, %s1249_s16 }
  0x72   : > { %493 = vrot.lane.b32.xlu0 %v1421_v5, %s1249_s16 }
  0x75   : > { %499 = vrot.lane.b32.xlu1 %v1423_v6, %s1249_s16 }
  0x76   : > { %497 = vrot.lane.b32.xlu0 %v1425_v7, %s1249_s16 }
  0x79   : > { %503 = vrot.lane.b32.xlu1 %v1433_v8, %s1249_s16 }
  0x7a   : > { %501 = vrot.lane.b32.xlu0 %v1435_v9, %s1249_s16 }
  0x7d   : > { %550 = vrot.lane.b32.xlu1 %v1413_v3, %s1250_s19 }
  0x7e   : > { %548 = vrot.lane.b32.xlu0 %v1399_v1, %s1250_s19 }
  0x81   : > { %554 = vrot.lane.b32.xlu1 %v1401_v2, %s1250_s19 }
  0x82   : > { %552 = vrot.lane.b32.xlu0 %v1397_v0, %s1250_s19 }
  0x85   : > { %558 = vrot.lane.b32.xlu1 %v1415_v4, %s1250_s19 }
  0x86   : > { %556 = vrot.lane.b32.xlu0 %v1421_v5, %s1250_s19 }
  0x89   : > { %562 = vrot.lane.b32.xlu1 %v1423_v6, %s1250_s19 }
  0x8a   : > { %560 = vrot.lane.b32.xlu0 %v1425_v7, %s1250_s19 }
  0x8d   : > { %566 = vrot.lane.b32.xlu1 %v1433_v8, %s1250_s19 }
  0x8e   : > { %564 = vrot.lane.b32.xlu0 %v1435_v9, %s1250_s19 }
  0xb3   : > { %v1479_v10 = vpop.permute.xlu1 %225 }
  0xb4   : > { %v1481_v11 = vpop.permute.xlu0 %221 }
  0xb7   : > { %v1483_v12 = vpop.permute.xlu1 %227 }
  0xb8   : > { %v224_v13 = vpop.permute.xlu0 %223 }
  0xbb   : > { %v232_v15 = vpop.permute.xlu1 %231 }
  0xbc   : > { %v1485_v16 = vpop.permute.xlu0 %229  ;;  %v249_v32 = vsel %vm243_vm2, %v232_v15, %v1481_v11  ;;  %v244_v27 = vsel %vm243_vm2, %v1481_v11, %v232_v15 }
  0xbd   : > { %v265_v36 = vsel %vm1505_vm3, %v249_v32, 0.0 }
  0xbe   : > { %v275_v43 = vadd.f32 %v265_v36, %v1399_v1 }
  0xbf   : > { %v1489_v19 = vpop.permute.xlu1 %235 }
  0xc0   : > { %v234_v20 = vpop.permute.xlu0 %233  ;;  %v251_v37 = vsel %vm243_vm2, %v1489_v19, %v1479_v10  ;;  %v246_v39 = vsel %vm243_vm2, %v1479_v10, %v1489_v19 }
  0xc1   : > { %v250_v38 = vsel %vm243_vm2, %v234_v20, %v224_v13  ;;  %v269_v44 = vsel %vm1505_vm3, %v251_v37, 0.0  ;;  %v245_v63 = vsel %vm243_vm2, %v224_v13, %v234_v20  ;;  %v270_v51 = vsel %vm1576_vm6, %v246_v39, 0.0 }
  0xc2   : > { %v267_v46 = vsel %vm1505_vm3, %v250_v38, 0.0  ;;  %v279_v52 = vadd.f32 %v269_v44, %v1397_v0  ;;  %v268_v15 = vsel %vm1576_vm6, %v245_v63, 0.0 }
  0xc3   : > { %v1497_v25 = vpop.permute.xlu1 %239  ;;  %v277_v56 = vadd.f32 %v267_v46, %v1413_v3 }
  0xc4   : > { %v1499_v26 = vpop.permute.xlu0 %237  ;;  %v253_v47 = vsel %vm243_vm2, %v1497_v25, %v1485_v16 }
  0xc5   : > { %v252_v49 = vsel %vm243_vm2, %v1499_v26, %v1483_v12  ;;  %v273_v57 = vsel %vm1505_vm3, %v253_v47, 0.0  ;;  %v247_v44 = vsel %vm243_vm2, %v1483_v12, %v1499_v26 }
  0xc6   : > { %v271_v60 = vsel %vm1505_vm3, %v252_v49, 0.0  ;;  %v283_v30 = vadd.f32 %v273_v57, %v1421_v5  ;;  %v272_v19 = vsel %vm1576_vm6, %v247_v44, 0.0 }
  0xc7   : > { %v289_v28 = vpop.permute.xlu1 %288  ;;  %v281_v20 = vadd.f32 %v271_v60, %v1401_v2 }
  0xc8   : > { %v287_v29 = vpop.permute.xlu0 %286 }
  0xcb   : > { %v293_v34 = vpop.permute.xlu1 %292 }
  0xcc   : > { %v1513_v35 = vpop.permute.xlu0 %290 }
  0xcf   : > { %v297_v41 = vpop.permute.xlu1 %296 }
  0xd0   : > { %v1530_v42 = vpop.permute.xlu0 %294  ;;  %v307_v45 = vsel %vm306_vm4, %v287_v29, %v297_v41  ;;  %v312_v37 = vsel %vm306_vm4, %v297_v41, %v287_v29 }
  0xd1   : > { %v328_v48 = vsel %vm1524_vm5, %v307_v45, 0.0  ;;  %v329_v12 = vsel %vm1584_vm7, %v312_v37, 0.0 }
  0xd2   : > { %v1549_v50 = vadd.f32 %v328_v48, %v275_v43  ;;  %v266_v43 = vsel %vm1576_vm6, %v244_v27, 0.0  ;;  %v278_v48 = vadd.f32 %v268_v15, %v1425_v7 }
  0xd3   : > { %v301_v54 = vpop.permute.xlu1 %300  ;;  %v276_v10 = vadd.f32 %v266_v43, %v1415_v4 }
  0xd4   : > { %v299_v55 = vpop.permute.xlu0 %298  ;;  %v309_v58 = vsel %vm306_vm4, %v1513_v35, %v301_v54  ;;  %349 = vrot.lane.b32.xlu0 %v1549_v50, %s1252_s24  ;;  %v314_v49 = vsel %vm306_vm4, %v301_v54, %v1513_v35  ;;  %v282_v54 = vadd.f32 %v272_v19, %v1435_v9 }
  0xd5   : > { %v308_v59 = vsel %vm306_vm4, %v289_v28, %v299_v55  ;;  %v332_v61 = vsel %vm1524_vm5, %v309_v58, 0.0  ;;  %v313_v33 = vsel %vm306_vm4, %v299_v55, %v289_v28  ;;  %v1651_v53 = vadd.f32 %v329_v12, %v276_v10 }
  0xd6   : > { %v330_v62 = vsel %vm1524_vm5, %v308_v59, 0.0  ;;  %v1572_v14 = vadd.f32 %v332_v61, %v279_v52  ;;  %v331_v41 = vsel %vm1584_vm7, %v313_v33, 0.0  ;;  %v333_v57 = vsel %vm1584_vm7, %v314_v49, 0.0 }
  0xd7   : > { %v1574_v18 = vadd.f32 %v330_v62, %v277_v56  ;;  %v305_v32 = vpop.permute.xlu1 %304  ;;  %v1645_v52 = vadd.f32 %v331_v41, %v278_v48  ;;  %v280_v58 = vadd.f32 %v270_v51, %v1423_v6 }
  0xd8   : > { %v303_v13 = vpop.permute.xlu0 %302  ;;  %v311_v36 = vsel %vm306_vm4, %v1530_v42, %v305_v32  ;;  %353 = vrot.lane.b32.xlu0 %v1572_v14, %s1252_s24 }
  0xd9   : > { %v310_v11 = vsel %vm306_vm4, %v293_v34, %v303_v13  ;;  %v336_v38 = vsel %vm1524_vm5, %v311_v36, 0.0  ;;  %351 = vrot.lane.b32.xlu1 %v1574_v18, %s1252_s24  ;;  %v315_v26 = vsel %vm306_vm4, %v303_v13, %v293_v34  ;;  %v248_v34 = vsel %vm243_vm2, %v1485_v16, %v1497_v25 }
  0xda   : > { %v334_v28 = vsel %vm1524_vm5, %v310_v11, 0.0  ;;  %v1614_v45 = vadd.f32 %v336_v38, %v283_v30  ;;  %v335_v55 = vsel %vm1584_vm7, %v315_v26, 0.0  ;;  %v316_v16 = vsel %vm306_vm4, %v305_v32, %v1530_v42 }
  0xdb   : > { %v1616_v29 = vadd.f32 %v334_v28, %v281_v20  ;;  %v1624_v46 = vpop.permute.xlu1 %487  ;;  %v274_v25 = vsel %vm1576_vm6, %v248_v34, 0.0  ;;  %v1672_v59 = vadd.f32 %v335_v55, %v282_v54  ;;  %v1674_v60 = vadd.f32 %v333_v57, %v280_v58 }
  0xdc   : > { %v1626_v47 = vpop.permute.xlu0 %485  ;;  %357 = vrot.lane.b32.xlu0 %v1614_v45, %s1252_s24  ;;  %v337_v63 = vsel %vm1584_vm7, %v316_v16, 0.0  ;;  %v284_v42 = vadd.f32 %v274_v25, %v1433_v8  ;;  %v520_v20 = vrot.slane %v516_v31, %v1492_v21  ;;  %v579_v11 = vsel %vm547_vm9, 1, %v2452_v23 }
  0xdd   : > { %355 = vrot.lane.b32.xlu1 %v1616_v29, %s1252_s24  ;;  %v583_v37 = vrot.slane %v579_v11, %v1492_v21  ;;  %v524_v57 = vrot.slane %v516_v31, %v1528_v40  ;;  %v587_v16 = vrot.slane %v579_v11, %v1528_v40  ;;  %vm432_vm5 = vcmp.lt.s32.totalorder %v1494_v22, 112 }
  0xde   : > { %v1687_v24 = vadd.f32 %v337_v63, %v284_v42  ;;  %vm1713_vm11 = vcmp.eq.s32.totalorder %v520_v20, 1 }
  0xdf   : > { %v1655_v56 = vpop.permute.xlu1 %491  ;;  %vm1740_vm13 = vcmp.eq.s32.totalorder %v583_v37, 1  ;;  %vm1797_vm14 = vcmp.eq.s32.totalorder %v524_v57, 1  ;;  %vm1806_vm15 = vcmp.eq.s32.totalorder %v587_v16, 1 }
  0xe0   : > { %v1657_v35 = vpop.permute.xlu0 %489  ;;  %361 = vrot.lane.b32.xlu0 %v1645_v52, %s1252_s24 }
  0xe1   : > { %359 = vrot.lane.b32.xlu1 %v1651_v53, %s1252_s24 }
  0xe3   : > { %v1676_v61 = vpop.permute.xlu1 %495 }
  0xe4   : > { %v1678_v62 = vpop.permute.xlu0 %493  ;;  %365 = vrot.lane.b32.xlu0 %v1672_v59, %s1252_s24  ;;  %v511_v17 = vsel %vm505_vm10, %v1676_v61, %v1626_v47 }
  0xe5   : > { %363 = vrot.lane.b32.xlu1 %v1674_v60, %s1252_s24  ;;  %v527_v43 = vsel %vm1713_vm11, %v511_v17, 0.0 }
  0xe6   : > { %v537_v26 = vadd.f32 %v527_v43, %v1399_v1 }
  0xe7   : > { %v1689_v27 = vpop.permute.xlu1 %499 }
  0xe8   : > { %v498_v30 = vpop.permute.xlu0 %497  ;;  %412 = vrot.lane.b32.xlu0 %v1549_v50, %s1253_s30  ;;  %v513_v44 = vsel %vm505_vm10, %v1689_v27, %v1657_v35  ;;  %v508_v41 = vsel %vm505_vm10, %v1657_v35, %v1689_v27 }
  0xe9   : > { %367 = vrot.lane.b32.xlu1 %v1687_v24, %s1252_s24  ;;  %v512_v39 = vsel %vm505_vm10, %v498_v30, %v1624_v46  ;;  %v531_v10 = vsel %vm1713_vm11, %v513_v44, 0.0  ;;  %v507_v44 = vsel %vm505_vm10, %v1624_v46, %v498_v30 }
  0xea   : > { %v529_v49 = vsel %vm1713_vm11, %v512_v39, 0.0  ;;  %v541_v58 = vadd.f32 %v531_v10, %v1397_v0  ;;  %v506_v10 = vsel %vm505_vm10, %v1626_v47, %v1676_v61  ;;  %v530_v61 = vsel %vm1797_vm14, %v507_v44, 0.0 }
  0xeb   : > { %v1697_v32 = vpop.permute.xlu1 %503  ;;  %v539_v42 = vadd.f32 %v529_v49, %v1413_v3  ;;  %v528_v16 = vsel %vm1797_vm14, %v506_v10, 0.0 }
  0xec   : > { %v1699_v13 = vpop.permute.xlu0 %501  ;;  %416 = vrot.lane.b32.xlu0 %v1572_v14, %s1253_s30  ;;  %v515_v51 = vsel %vm505_vm10, %v1697_v32, %v1678_v62 }
  0xed   : > { %414 = vrot.lane.b32.xlu1 %v1574_v18, %s1253_s30  ;;  %v514_v55 = vsel %vm505_vm10, %v1699_v13, %v1655_v56  ;;  %v535_v20 = vsel %vm1713_vm11, %v515_v51, 0.0 }
  0xee   : > { %v533_v31 = vsel %vm1713_vm11, %v514_v55, 0.0 }
  0xef   : > { %v551_v33 = vpop.permute.xlu1 %550  ;;  %v543_v51 = vadd.f32 %v533_v31, %v1401_v2 }
  0xf0   : > { %v549_v36 = vpop.permute.xlu0 %548  ;;  %420 = vrot.lane.b32.xlu0 %v1614_v45, %s1253_s30 }
  0xf1   : > { %418 = vrot.lane.b32.xlu1 %v1616_v29, %s1253_s30 }
  0xf3   : > { %v1722_v38 = vpop.permute.xlu1 %554 }
  0xf4   : > { %v1724_v28 = vpop.permute.xlu0 %552  ;;  %424 = vrot.lane.b32.xlu0 %v1645_v52, %s1253_s30 }
  0xf5   : > { %422 = vrot.lane.b32.xlu1 %v1651_v53, %s1253_s30 }
  0xf7   : > { %v559_v48 = vpop.permute.xlu1 %558 }
  0xf8   : > { %v1744_v12 = vpop.permute.xlu0 %556  ;;  %v569_v19 = vsel %vm568_vm12, %v549_v36, %v559_v48  ;;  %428 = vrot.lane.b32.xlu0 %v1672_v59, %s1253_s30  ;;  %v574_v57 = vsel %vm568_vm12, %v559_v48, %v549_v36 }
  0xf9   : > { %v590_v34 = vsel %vm1740_vm13, %v569_v19, 0.0  ;;  %426 = vrot.lane.b32.xlu1 %v1674_v60, %s1253_s30  ;;  %v545_v19 = vadd.f32 %v535_v20, %v1421_v5  ;;  %v540_v20 = vadd.f32 %v530_v61, %v1425_v7 }
  0xfa   : > { %v1767_v54 = vadd.f32 %v590_v34, %v537_v26 }
  0xfb   : > { %v563_v25 = vpop.permute.xlu1 %562 }
  0xfc   : > { %2488 = vst [vmem:[#allocation11_spill] sm:$0xff] %v1767_v54  ;;  %v561_v63 = vpop.permute.xlu0 %560  ;;  %v571_v17 = vsel %vm568_vm12, %v1724_v28, %v563_v25  ;;  %611 = vrot.lane.b32.xlu0 %v1767_v54, %s1254_s25  ;;  %v576_v27 = vsel %vm568_vm12, %v563_v25, %v1724_v28 }
  0xfd   : > { %v570_v37 = vsel %vm568_vm12, %v551_v33, %v561_v63  ;;  %v594_v11 = vsel %vm1740_vm13, %v571_v17, 0.0  ;;  %430 = vrot.lane.b32.xlu1 %v1687_v24, %s1253_s30  ;;  %v575_v34 = vsel %vm568_vm12, %v561_v63, %v551_v33  ;;  %v509_v63 = vsel %vm505_vm10, %v1655_v56, %v1699_v13 }
  0xfe   : > { %v592_v43 = vsel %vm1740_vm13, %v570_v37, 0.0  ;;  %v1793_v39 = vadd.f32 %v594_v11, %v541_v58  ;;  %v593_v48 = vsel %vm1806_vm15, %v575_v34, 0.0  ;;  %v591_v17 = vsel %vm1806_vm15, %v574_v57, 0.0 }
  0xff   : > { %v1795_v26 = vadd.f32 %v592_v43, %v539_v42  ;;  %v567_v46 = vpop.permute.xlu1 %566  ;;  %v538_v13 = vadd.f32 %v528_v16, %v1415_v4  ;;  %v534_v35 = vsel %vm1797_vm14, %v509_v63, 0.0  ;;  %v532_v37 = vsel %vm1797_vm14, %v508_v41, 0.0  ;;  %v1920_v63 = vld [vmem:[#allocation2] ss:$2 sm:$0x3] }
 0x100   : > { %2489 = vst [vmem:[#allocation12_spill] sm:$0xff] %v1793_v39  ;;  %v565_v30 = vpop.permute.xlu0 %564  ;;  %v573_v55 = vsel %vm568_vm12, %v1744_v12, %v567_v46  ;;  %615 = vrot.lane.b32.xlu0 %v1793_v39, %s1254_s25  ;;  %v1865_v31 = vadd.f32 %v593_v48, %v540_v20  ;;  %v544_v28 = vadd.f32 %v534_v35, %v1435_v9  ;;  %v595_v25 = vsel %vm1806_vm15, %v576_v27, 0.0 }
 0x101   : > { %2490 = vst [vmem:[#allocation13_spill] sm:$0xff] %v1795_v26  ;;  %v572_v47 = vsel %vm568_vm12, %v1722_v38, %v565_v30  ;;  %v598_v33 = vsel %vm1740_vm13, %v573_v55, 0.0  ;;  %613 = vrot.lane.b32.xlu1 %v1795_v26, %s1254_s25  ;;  %v577_v56 = vsel %vm568_vm12, %v565_v30, %v1722_v38  ;;  %v510_v38 = vsel %vm505_vm10, %v1678_v62, %v1697_v32 }
 0x102   : > { %v596_v58 = vsel %vm1740_vm13, %v572_v47, 0.0  ;;  %v1837_v42 = vadd.f32 %v598_v33, %v545_v19  ;;  %2497 = vst [vmem:[#allocation16_spill] sm:$0xff] %v1865_v31  ;;  %v1871_v11 = vadd.f32 %v591_v17, %v538_v13  ;;  %v597_v43 = vsel %vm1806_vm15, %v577_v56, 0.0 }
 0x103   : > { %v1839_v36 = vadd.f32 %v596_v58, %v543_v51  ;;  %v542_v44 = vadd.f32 %v532_v37, %v1423_v6  ;;  %v578_v10 = vsel %vm568_vm12, %v567_v46, %v1744_v12  ;;  %v536_v62 = vsel %vm1797_vm14, %v510_v38, 0.0 }
 0x104   : > { %2495 = vst [vmem:[#allocation14_spill] sm:$0xff] %v1837_v42  ;;  %619 = vrot.lane.b32.xlu0 %v1837_v42, %s1254_s25  ;;  %2498 = vst [vmem:[#allocation17_spill] sm:$0xff] %v1871_v11  ;;  %v1888_v32 = vadd.f32 %v597_v43, %v544_v28  ;;  %v599_v30 = vsel %vm1806_vm15, %v578_v10, 0.0  ;;  %v546_v51 = vadd.f32 %v536_v62, %v1433_v8  ;;  %vm348_vm1 = vcmp.ge.s32.totalorder %v1920_v63, 16 }
 0x105   : > { %2496 = vst [vmem:[#allocation15_spill] sm:$0xff] %v1839_v36  ;;  %617 = vrot.lane.b32.xlu1 %v1839_v36, %s1254_s25  ;;  %v1890_v19 = vadd.f32 %v595_v25, %v542_v44  ;;  %vm411_vm2 = vcmp.lt.s32.totalorder %v1920_v63, 240  ;;  %v380_v56 = vsel %vm348_vm1, 1, %v2452_v23  ;;  %vm610_vm8 = vcmp.ge.s32.totalorder %v1920_v63, 32 }
 0x106   : > { %2499 = vst [vmem:[#allocation18_spill] sm:$0xff] %v1888_v32  ;;  %v1899_v12 = vadd.f32 %v599_v30, %v546_v51  ;;  %v443_v27 = vsel %vm411_vm2, 1, %v2452_v23  ;;  %v384_v37 = vrot.slane %v380_v56, %v1492_v21  ;;  %v388_v38 = vrot.slane %v380_v56, %v1528_v40 }
 0x107   : > { %2500 = vst [vmem:[#allocation19_spill] sm:$0xff] %v1890_v19  ;;  %v447_v43 = vrot.slane %v443_v27, %v1492_v21  ;;  %v451_v25 = vrot.slane %v443_v27, %v1528_v40  ;;  %v1958_v51 = vmul.f32 8.0, %v1415_v4  ;;  %vm673_vm9 = vcmp.lt.s32.totalorder %v1920_v63, 224 }
 0x108   : > { %623 = vrot.lane.b32.xlu0 %v1865_v31, %s1254_s25  ;;  %2501 = vst [vmem:[#allocation20_spill] sm:$0xff] %v1899_v12  ;;  %vm1944_vm3 = vcmp.eq.s32.totalorder %v384_v37, 1  ;;  %vm1948_vm4 = vcmp.eq.s32.totalorder %v388_v38, 1  ;;  %v1969_v37 = vmul.f32 8.0, %v1399_v1  ;;  %vm631_vm10 = vcmp.lt.s32.totalorder %v1494_v22, 32 }
 0x109   : > { %621 = vrot.lane.b32.xlu1 %v1871_v11, %s1254_s25  ;;  %vm1953_vm6 = vcmp.eq.s32.totalorder %v447_v43, 1  ;;  %vm1964_vm7 = vcmp.eq.s32.totalorder %v451_v25, 1  ;;  %v1988_v25 = vmul.f32 8.0, %v1401_v2  ;;  %vm694_vm13 = vcmp.lt.s32.totalorder %v1494_v22, 96 }
 0x10c   : > { %627 = vrot.lane.b32.xlu0 %v1888_v32, %s1254_s25 }
 0x10d   : > { %625 = vrot.lane.b32.xlu1 %v1890_v19, %s1254_s25 }
 0x110   : > { %674 = vrot.lane.b32.xlu0 %v1767_v54, %s1255_s3 }
 0x111   : > { %629 = vrot.lane.b32.xlu1 %v1899_v12, %s1254_s25 }
 0x114   : > { %678 = vrot.lane.b32.xlu0 %v1793_v39, %s1255_s3 }
 0x115   : > { %676 = vrot.lane.b32.xlu1 %v1795_v26, %s1255_s3 }
 0x118   : > { %682 = vrot.lane.b32.xlu0 %v1837_v42, %s1255_s3  ;;  %v1979_v42 = vmul.f32 8.0, %v1425_v7 }
 0x119   : > { %680 = vrot.lane.b32.xlu1 %v1839_v36, %s1255_s3 }
 0x11c   : > { %686 = vrot.lane.b32.xlu0 %v1865_v31, %s1255_s3 }
 0x11d   : > { %684 = vrot.lane.b32.xlu1 %v1871_v11, %s1255_s3  ;;  %v2008_v11 = vmul.f32 8.0, %v1421_v5 }
 0x11f   : > { %2511 = vst [vmem:[#allocation22_spill] sm:$0xff] %v2008_v11 }
 0x120   : > { %690 = vrot.lane.b32.xlu0 %v1888_v32, %s1255_s3  ;;  %v1991_v32 = vmul.f32 8.0, %v1435_v9 }
 0x121   : > { %688 = vrot.lane.b32.xlu1 %v1890_v19, %s1255_s3 }
 0x122   : > { %2510 = vst [vmem:[#allocation21_spill] sm:$0xff] %v1991_v32 }
 0x125   : > { %692 = vrot.lane.b32.xlu1 %v1899_v12, %s1255_s3  ;;  %v1976_v12 = vmul.f32 8.0, %v1413_v3 }
 0x146   : > { %v350_v15 = vpop.permute.xlu0 %349 }
 0x14a   : > { %v1913_v49 = vpop.permute.xlu0 %353 }
 0x14b   : > { %v352_v46 = vpop.permute.xlu1 %351 }
 0x14e   : > { %v358_v34 = vpop.permute.xlu0 %357 }
 0x14f   : > { %v1915_v55 = vpop.permute.xlu1 %355 }
 0x152   : > { %v362_v47 = vpop.permute.xlu0 %361 }
 0x153   : > { %v360_v61 = vpop.permute.xlu1 %359  ;;  %v376_v56 = vsel %vm369_vm0, %v362_v47, %v352_v46 }
 0x154   : > { %v370_v43 = vsel %vm369_vm0, %v350_v15, %v360_v61  ;;  %v375_v23 = vsel %vm369_vm0, %v360_v61, %v350_v15  ;;  %v393_v15 = vsel %vm1944_vm3, %v376_v56, 0.0  ;;  %v2011_v56 = vmul.f32 8.0, %v1433_v8 }
 0x155   : > { %v391_v31 = vsel %vm1944_vm3, %v375_v23, 0.0  ;;  %v392_v26 = vsel %vm1948_vm4, %v370_v43, 0.0  ;;  %v403_v23 = vadd.f32 %v393_v15, %v1574_v18 }
 0x156   : > { %v1917_v57 = vpop.permute.xlu0 %365  ;;  %2512 = vst [vmem:[#allocation23_spill] sm:$0xff] %v2011_v56  ;;  %v401_v11 = vadd.f32 %v391_v31, %v1549_v50  ;;  %v402_v32 = vadd.f32 %v392_v26, %v1651_v53 }
 0x157   : > { %v364_v33 = vpop.permute.xlu1 %363  ;;  %v378_v50 = vsel %vm369_vm0, %v1917_v57, %v1915_v55 }
 0x158   : > { %v377_v18 = vsel %vm369_vm0, %v364_v33, %v1913_v49 }
 0x15a   : > { %v413_v58 = vpop.permute.xlu0 %412 }
 0x15b   : > { %v368_v16 = vpop.permute.xlu1 %367 }
 0x15c   : > { %v1924_v41 = vsel %vm369_vm0, %v358_v34, %v368_v16  ;;  %v1928_v48 = vsel %vm369_vm0, %v368_v16, %v358_v34  ;;  %v371_v16 = vsel %vm369_vm0, %v352_v46, %v362_v47  ;;  %v1982_v46 = vmul.f32 8.0, %v1397_v0 }
 0x15d   : > { %v1985_v47 = vmul.f32 8.0, %v1423_v6  ;;  %v394_v61 = vsel %vm1948_vm4, %v371_v16, 0.0 }
 0x15e   : > { %v1930_v20 = vpop.permute.xlu0 %416 }
 0x15f   : > { %v415_v17 = vpop.permute.xlu1 %414 }
 0x162   : > { %v1935_v13 = vpop.permute.xlu0 %420 }
 0x163   : > { %v1937_v35 = vpop.permute.xlu1 %418 }
 0x166   : > { %v425_v28 = vpop.permute.xlu0 %424 }
 0x167   : > { %v423_v44 = vpop.permute.xlu1 %422  ;;  %v434_v36 = vsel %vm432_vm5, %v415_v17, %v425_v28  ;;  %v439_v19 = vsel %vm432_vm5, %v425_v28, %v415_v17  ;;  %v404_v28 = vadd.f32 %v394_v61, %v1645_v52  ;;  %v373_v52 = vsel %vm369_vm0, %v1915_v55, %v1917_v57 }
 0x168   : > { %v433_v54 = vsel %vm432_vm5, %v413_v58, %v423_v44  ;;  %v438_v17 = vsel %vm432_vm5, %v423_v44, %v413_v58  ;;  %v456_v43 = vsel %vm1953_vm6, %v434_v36, 0.0  ;;  %v457_v56 = vsel %vm1964_vm7, %v439_v19, 0.0 }
 0x169   : > { %v372_v58 = vsel %vm369_vm0, %v1913_v49, %v364_v33  ;;  %v454_v53 = vsel %vm1953_vm6, %v433_v54, 0.0  ;;  %v455_v26 = vsel %vm1964_vm7, %v438_v17, 0.0  ;;  %v466_v31 = vadd.f32 %v456_v43, %v403_v23 }
 0x16a   : > { %v429_v34 = vpop.permute.xlu0 %428  ;;  %v467_v19 = vadd.f32 %v457_v56, %v404_v28  ;;  %v395_v55 = vsel %vm1944_vm3, %v377_v18, 0.0  ;;  %v396_v54 = vsel %vm1948_vm4, %v372_v58, 0.0  ;;  %v2513_v57 = vmov 0  }
 0x16b   : > { %v427_v38 = vpop.permute.xlu1 %426  ;;  %v642_v15 = vsel %vm610_vm8, 1, %v2513_v57  ;;  %v2067_v61 = vsel %vm673_vm9, 1, %v2513_v57  ;;  %v397_v56 = vsel %vm1944_vm3, %v378_v50, 0.0  ;;  %v465_v17 = vadd.f32 %v455_v26, %v402_v32 }
 0x16c   : > { %v435_v49 = vsel %vm432_vm5, %v1930_v20, %v427_v38  ;;  %v440_v33 = vsel %vm432_vm5, %v427_v38, %v1930_v20  ;;  %v398_v20 = vsel %vm1948_vm4, %v373_v52, 0.0  ;;  %v464_v38 = vadd.f32 %v454_v53, %v401_v11 }
 0x16d   : > { %v458_v28 = vsel %vm1953_vm6, %v435_v49, 0.0  ;;  %v459_v43 = vsel %vm1964_vm7, %v440_v33, 0.0  ;;  %v436_v63 = vsel %vm432_vm5, %v1937_v35, %v429_v34  ;;  %v441_v58 = vsel %vm432_vm5, %v429_v34, %v1937_v35 }
 0x16e   : > { %v2001_v39 = vpop.permute.xlu0 %611  ;;  %v405_v11 = vadd.f32 %v395_v55, %v1572_v14  ;;  %v406_v32 = vadd.f32 %v396_v54, %v1674_v60  ;;  %v476_v52 = vsub.f32 %v466_v31, %v1413_v3  ;;  %v477_v50 = vsub.f32 %v467_v19, %v1425_v7 }
 0x16f   : > { %v2013_v16 = vpop.permute.xlu1 %430  ;;  %v646_v53 = vrot.slane %v642_v15, %v1492_v21  ;;  %v650_v26 = vrot.slane %v642_v15, %v1528_v40  ;;  %v709_v49 = vrot.slane %v2067_v61, %v1492_v21  ;;  %v713_v35 = vrot.slane %v2067_v61, %v1528_v40 }
 0x170   : > { %v468_v34 = vadd.f32 %v458_v28, %v405_v11  ;;  %v469_v33 = vadd.f32 %v459_v43, %v406_v32  ;;  %v460_v14 = vsel %vm1953_vm6, %v436_v63, 0.0  ;;  %v461_v3 = vsel %vm1964_vm7, %v441_v58, 0.0  ;;  %v1095_v43 = vld [vmem:[%s1404_s26 + $0xa0] sm:$0xff] }
 0x171   : > { %v407_v31 = vadd.f32 %v397_v56, %v1616_v29  ;;  %v408_v19 = vadd.f32 %v398_v20, %v1672_v59  ;;  %v474_v55 = vsub.f32 %v464_v38, %v1399_v1  ;;  %v475_v21 = vsub.f32 %v465_v17, %v1415_v4 }
 0x172   : > { %v2035_v44 = vpop.permute.xlu0 %615  ;;  %v399_v54 = vsel %vm1944_vm3, %v1928_v48, 0.0  ;;  %v400_v57 = vsel %vm1948_vm4, %v1924_v41, 0.0  ;;  %v758_v15 = vmul.f32 -0.5, %v476_v52  ;;  %v759_v61 = vmul.f32 -0.5, %v477_v50 }
 0x173   : > { %v2049_v36 = vpop.permute.xlu1 %613  ;;  %v470_v29 = vadd.f32 %v460_v14, %v407_v31  ;;  %v471_v56 = vadd.f32 %v461_v3, %v408_v19  ;;  %v437_v1 = vsel %vm432_vm5, %v1935_v13, %v2013_v16  ;;  %v442_v4 = vsel %vm432_vm5, %v2013_v16, %v1935_v13 }
 0x174   : > { %v808_v59 = vmul.f32 -0.6, %v476_v52  ;;  %v809_v48 = vmul.f32 -0.6, %v477_v50  ;;  %v478_v10 = vsub.f32 %v468_v34, %v1397_v0  ;;  %v479_v41 = vsub.f32 %v469_v33, %v1423_v6 }
 0x175   : > { %v409_v20 = vadd.f32 %v399_v54, %v1614_v45  ;;  %v410_v38 = vadd.f32 %v400_v57, %v1687_v24  ;;  %v756_v17 = vmul.f32 -0.5, %v474_v55  ;;  %v757_v28 = vmul.f32 -0.5, %v475_v21 }
 0x176   : > { %v2073_v23 = vpop.permute.xlu0 %619  ;;  %vm2124_vm11 = vcmp.eq.s32.totalorder %v646_v53, 1  ;;  %vm2128_vm12 = vcmp.eq.s32.totalorder %v650_v26, 1  ;;  %v806_v16 = vmul.f32 -0.6, %v474_v55  ;;  %v807_v0 = vmul.f32 -0.6, %v475_v21 }
 0x177   : > { %v2085_v18 = vpop.permute.xlu1 %617  ;;  %v462_v6 = vsel %vm1953_vm6, %v437_v1, 0.0  ;;  %v463_v45 = vsel %vm1964_vm7, %v442_v4, 0.0  ;;  %v2137_v24 = vadd.f32 %v758_v15, %v1976_v12  ;;  %v2140_v58 = vadd.f32 %v759_v61, %v1979_v42 }
 0x178   : > { %v480_v11 = vsub.f32 %v470_v29, %v1401_v2  ;;  %v481_v32 = vsub.f32 %v471_v56, %v1435_v9  ;;  %v2145_v52 = vadd.f32 %v808_v59, %v1976_v12  ;;  %v2148_v50 = vadd.f32 %v809_v48, %v1979_v42  ;;  %v2522_v48 = vld [vmem:[#allocation21_spill] sm:$0xff] }
 0x179   : > { %v760_v30 = vmul.f32 -0.5, %v478_v10  ;;  %v761_v53 = vmul.f32 -0.5, %v479_v41  ;;  %v2153_v26 = vadd.f32 %v756_v17, %v1969_v37  ;;  %v2156_v34 = vadd.f32 %v757_v28, %v1958_v51 }
 0x17a   : > { %v624_v60 = vpop.permute.xlu0 %623  ;;  %v472_v33 = vadd.f32 %v462_v6, %v409_v20  ;;  %v473_v2 = vadd.f32 %v463_v45, %v410_v38  ;;  %v2159_v9 = vadd.f32 %v806_v16, %v1969_v37  ;;  %v2162_v12 = vadd.f32 %v807_v0, %v1958_v51  ;;  %v2523_v45 = vld [vmem:[#allocation11_spill] sm:$0xff] }
 0x17b   : > { %v622_v40 = vpop.permute.xlu1 %621  ;;  %v810_v42 = vmul.f32 -0.6, %v478_v10  ;;  %v811_v3 = vmul.f32 -0.6, %v479_v41  ;;  %v762_v31 = vmul.f32 -0.5, %v480_v11  ;;  %v763_v19 = vmul.f32 -0.5, %v481_v32 }
 0x17c   : > { %v812_v55 = vmul.f32 -0.6, %v480_v11  ;;  %v813_v21 = vmul.f32 -0.6, %v481_v32  ;;  %vm2165_vm14 = vcmp.eq.s32.totalorder %v709_v49, 1  ;;  %vm2169_vm15 = vcmp.eq.s32.totalorder %v713_v35, 1 }
 0x17d   : > { %v2174_v37 = vadd.f32 %v760_v30, %v1982_v46  ;;  %v2177_v51 = vadd.f32 %v761_v53, %v1985_v47  ;;  %v633_v15 = vsel %vm631_vm10, %v2049_v36, %v624_v60  ;;  %v638_v49 = vsel %vm631_vm10, %v624_v60, %v2049_v36  ;;  %v2524_v32 = vld [vmem:[#allocation17_spill] sm:$0xff] }
 0x17e   : > { %v628_v62 = vpop.permute.xlu0 %627  ;;  %v2188_v35 = vsub.f32 %v472_v33, %v1421_v5  ;;  %v2191_v29 = vsub.f32 %v473_v2, %v1433_v8  ;;  %v632_v56 = vsel %vm631_vm10, %v2001_v39, %v622_v40  ;;  %v637_v1 = vsel %vm631_vm10, %v622_v40, %v2001_v39  ;;  %v2525_v53 = vld [vmem:[#allocation13_spill] sm:$0xff]  ;;  %v2526_v2 = vld [vmem:[#allocation16_spill] sm:$0xff] }
 0x17f   : > { %v626_v13 = vpop.permute.xlu1 %625  ;;  %v635_v8 = vsel %vm631_vm10, %v2085_v18, %v628_v62  ;;  %v640_v60 = vsel %vm631_vm10, %v628_v62, %v2085_v18  ;;  %v2212_v59 = vadd.f32 %v810_v42, %v1982_v46  ;;  %v2215_v39 = vadd.f32 %v811_v3, %v1985_v47  ;;  %v2527_v3 = vld [vmem:[#allocation12_spill] sm:$0xff] }
 0x180   : > { %v634_v36 = vsel %vm631_vm10, %v2035_v44, %v626_v13  ;;  %v639_v5 = vsel %vm631_vm10, %v626_v13, %v2035_v44  ;;  %v2218_v40 = vadd.f32 %v762_v31, %v1988_v25  ;;  %v2221_v10 = vadd.f32 %v763_v19, %v2522_v48  ;;  %v2528_v31 = vld [vmem:[#allocation19_spill] sm:$0xff] }
 0x181   : > { %v653_v44 = vsel %vm2124_vm11, %v637_v1, 0.0  ;;  %v654_v41 = vsel %vm2128_vm12, %v632_v56, 0.0  ;;  %v655_v18 = vsel %vm2124_vm11, %v638_v49, 0.0  ;;  %v656_v46 = vsel %vm2128_vm12, %v633_v15, 0.0  ;;  %v2530_v15 = vld [vmem:[#allocation18_spill] sm:$0xff] }
 0x182   : > { %v2150_v27 = vpop.permute.xlu0 %674  ;;  %v657_v62 = vsel %vm2124_vm11, %v639_v5, 0.0  ;;  %v658_v20 = vsel %vm2128_vm12, %v634_v36, 0.0  ;;  %v659_v38 = vsel %vm2124_vm11, %v640_v60, 0.0  ;;  %v660_v17 = vsel %vm2128_vm12, %v635_v8, 0.0 }
 0x183   : > { %v630_v14 = vpop.permute.xlu1 %629  ;;  %v2242_v13 = vadd.f32 %v812_v55, %v1988_v25  ;;  %v2245_v16 = vadd.f32 %v813_v21, %v2522_v48  ;;  %v2248_v0 = vmul.f32 -0.5, %v2188_v35  ;;  %v2251_v6 = vmul.f32 -0.5, %v2191_v29  ;;  %v2529_v55 = vld [vmem:[#allocation15_spill] sm:$0xff] }
 0x184   : > { %v663_v11 = vadd.f32 %v653_v44, %v2523_v45  ;;  %v664_v30 = vadd.f32 %v654_v41, %v2524_v32  ;;  %v665_v33 = vadd.f32 %v655_v18, %v2525_v53  ;;  %v666_v42 = vadd.f32 %v656_v46, %v2526_v2  ;;  %v1094_v45 = vld [vmem:[%s1404_s26 + $0xb0] sm:$0xff] }
 0x185   : > { %v2258_v25 = vadd.f32 %v657_v62, %v2527_v3  ;;  %v2261_v19 = vadd.f32 %v658_v20, %v2528_v31  ;;  %v2264_v21 = vadd.f32 %v659_v38, %v2529_v55  ;;  %v2267_v49 = vadd.f32 %v660_v17, %v2530_v15  ;;  %v1096_v31 = vld [vmem:[%s1404_s26 + $0xa8] sm:$0xff] }
 0x186   : > { %v2185_v61 = vpop.permute.xlu0 %678  ;;  %v2272_v1 = vsel %vm631_vm10, %v2073_v23, %v630_v14  ;;  %v2277_v36 = vsel %vm631_vm10, %v630_v14, %v2073_v23 }
 0x187   : > { %v677_v4 = vpop.permute.xlu1 %676  ;;  %v662_v62 = vsel %vm2128_vm12, %v2272_v1, 0.0 }
 0x18a   : > { %v2231_v47 = vpop.permute.xlu0 %682 }
 0x18b   : > { %v681_v28 = vpop.permute.xlu1 %680 }
 0x18e   : > { %v687_v56 = vpop.permute.xlu0 %686 }
 0x18f   : > { %v685_v5 = vpop.permute.xlu1 %684  ;;  %v696_v8 = vsel %vm694_vm13, %v677_v4, %v687_v56  ;;  %v701_v60 = vsel %vm694_vm13, %v687_v56, %v677_v4 }
 0x190   : > { %v695_v48 = vsel %vm694_vm13, %v2150_v27, %v685_v5  ;;  %v700_v44 = vsel %vm694_vm13, %v685_v5, %v2150_v27  ;;  %v718_v23 = vsel %vm2165_vm14, %v696_v8, 0.0  ;;  %v719_v14 = vsel %vm2169_vm15, %v701_v60, 0.0 }
 0x191   : > { %v716_v41 = vsel %vm2165_vm14, %v695_v48, 0.0  ;;  %v717_v4 = vsel %vm2169_vm15, %v700_v44, 0.0  ;;  %v728_v18 = vadd.f32 %v718_v23, %v665_v33  ;;  %v729_v46 = vadd.f32 %v719_v14, %v666_v42 }
 0x192   : > { %v661_v27 = vsel %vm2124_vm11, %v2277_v36, 0.0  ;;  %v726_v20 = vadd.f32 %v716_v41, %v663_v11  ;;  %v727_v38 = vadd.f32 %v717_v4, %v664_v30  ;;  %v691_v17 = vpop.permute.xlu0 %690 }
 0x193   : > { %v738_v32 = vsub.f32 %v728_v18, %v1094_v45  ;;  %v739_v53 = vsub.f32 %v729_v46, %v1425_v7  ;;  %v689_v2 = vpop.permute.xlu1 %688  ;;  %v698_v33 = vsel %vm694_vm13, %v681_v28, %v691_v17  ;;  %v703_v42 = vsel %vm694_vm13, %v691_v17, %v681_v28  ;;  %v1097_v17 = vld [vmem:[%s1404_s26 + $0xc0] sm:$0xff]  ;;  %v1098_v45 = vld [vmem:[%s1404_s26 + $0xc8] sm:$0xff] }
 0x194   : > { %v736_v3 = vsub.f32 %v726_v20, %v1095_v43  ;;  %v737_v55 = vsub.f32 %v727_v38, %v1096_v31  ;;  %v697_v63 = vsel %vm694_vm13, %v2185_v61, %v689_v2  ;;  %v702_v11 = vsel %vm694_vm13, %v689_v2, %v2185_v61  ;;  %v2531_v2 = vld [vmem:[#allocation14_spill] sm:$0xff] }
 0x195   : > { %v778_v7 = vmul.f32 -0.125, %v738_v32  ;;  %v779_v30 = vmul.f32 -0.125, %v739_v53  ;;  %v828_v15 = vmul.f32 -0.12, %v738_v32  ;;  %v829_v56 = vmul.f32 -0.12, %v739_v53 }
 0x196   : > { %v776_v28 = vmul.f32 -0.125, %v736_v3  ;;  %v777_v1 = vmul.f32 -0.125, %v737_v55  ;;  %v826_v36 = vmul.f32 -0.12, %v736_v3  ;;  %v827_v5 = vmul.f32 -0.12, %v737_v55 }
 0x197   : > { %v788_v8 = vadd.f32 %v778_v7, %v2137_v24  ;;  %v789_v60 = vadd.f32 %v779_v30, %v2140_v58  ;;  %v838_v48 = vadd.f32 %v828_v15, %v2145_v52  ;;  %v839_v61 = vadd.f32 %v829_v56, %v2148_v50  ;;  %v693_v4 = vpop.permute.xlu1 %692  ;;  %v1099_v32 = vld [vmem:[%s1404_s26 + $0xd0] sm:$0xff]  ;;  %v1100_v53 = vld [vmem:[%s1404_s26 + $0xd8] sm:$0xff] }
 0x198   : > { %v786_v44 = vadd.f32 %v776_v28, %v2153_v26  ;;  %v787_v23 = vadd.f32 %v777_v1, %v2156_v34  ;;  %v836_v14 = vadd.f32 %v826_v36, %v2159_v9  ;;  %v837_v41 = vadd.f32 %v827_v5, %v2162_v12  ;;  %v2533_v1 = vld [vmem:[#allocation22_spill] sm:$0xff] }
 0x199   : > { %798 = vst [vmem:[%s1404_s26 + $0x10] sm:$0xff] %v788_v8  ;;  %799 = vst [vmem:[%s1404_s26 + $0x18] sm:$0xff] %v789_v60  ;;  %v720_v24 = vsel %vm2165_vm14, %v697_v63, 0.0  ;;  %v721_v58 = vsel %vm2169_vm15, %v702_v11, 0.0  ;;  %v722_v52 = vsel %vm2165_vm14, %v698_v33, 0.0  ;;  %v723_v50 = vsel %vm2169_vm15, %v703_v42, 0.0 }
 0x19a   : > { %993 = vst [vmem:[%s1404_s26 + $0x60] sm:$0xff] %v838_v48  ;;  %994 = vst [vmem:[%s1404_s26 + $0x68] sm:$0xff] %v839_v61  ;;  %v730_v26 = vadd.f32 %v720_v24, %v2258_v25  ;;  %v731_v34 = vadd.f32 %v721_v58, %v2261_v19  ;;  %v732_v9 = vadd.f32 %v722_v52, %v2264_v21  ;;  %v814_v18 = vmul.f32 -0.6, %v2188_v35  ;;  %v2532_v33 = vld [vmem:[#allocation20_spill] sm:$0xff] }
 0x19b   : > { %796 = vst [vmem:[%s1404_s26] sm:$0xff] %v786_v44  ;;  %797 = vst [vmem:[%s1404_s26 + $0x8] sm:$0xff] %v787_v23  ;;  %v733_v12 = vadd.f32 %v723_v50, %v2267_v49  ;;  %v815_v46 = vmul.f32 -0.6, %v2191_v29  ;;  %v699_v20 = vsel %vm694_vm13, %v2231_v47, %v693_v4  ;;  %v704_v38 = vsel %vm694_vm13, %v693_v4, %v2231_v47 }
 0x19c   : > { %991 = vst [vmem:[%s1404_s26 + $0x50] sm:$0xff] %v836_v14  ;;  %992 = vst [vmem:[%s1404_s26 + $0x58] sm:$0xff] %v837_v41  ;;  %v740_v25 = vsub.f32 %v730_v26, %v1097_v17  ;;  %v741_v19 = vsub.f32 %v731_v34, %v1098_v45  ;;  %v742_v21 = vsub.f32 %v732_v9, %v1099_v32  ;;  %v724_v42 = vsel %vm2165_vm14, %v699_v20, 0.0 }
 0x19d   : > { %v743_v49 = vsub.f32 %v733_v12, %v1100_v53  ;;  %v671_v35 = vadd.f32 %v661_v27, %v2531_v2  ;;  %v672_v29 = vadd.f32 %v662_v62, %v2532_v33  ;;  %v725_v43 = vsel %vm2169_vm15, %v704_v38, 0.0 }
 0x19e   : > { %v780_v22 = vmul.f32 -0.125, %v740_v25  ;;  %v781_v47 = vmul.f32 -0.125, %v741_v19  ;;  %v830_v3 = vmul.f32 -0.12, %v740_v25  ;;  %v831_v31 = vmul.f32 -0.12, %v741_v19 }
 0x19f   : > { %v782_v55 = vmul.f32 -0.125, %v742_v21  ;;  %v783_v63 = vmul.f32 -0.125, %v743_v49  ;;  %v832_v11 = vmul.f32 -0.12, %v742_v21  ;;  %v833_v27 = vmul.f32 -0.12, %v743_v49 }
 0x1a0   : > { %v790_v54 = vadd.f32 %v780_v22, %v2174_v37  ;;  %v791_v57 = vadd.f32 %v781_v47, %v2177_v51  ;;  %v840_v62 = vadd.f32 %v830_v3, %v2212_v59  ;;  %v841_v7 = vadd.f32 %v831_v31, %v2215_v39  ;;  %v1101_v59 = vld [vmem:[%s1404_s26 + $0xe0] sm:$0xff] }
 0x1a1   : > { %v792_v30 = vadd.f32 %v782_v55, %v2218_v40  ;;  %v793_v15 = vadd.f32 %v783_v63, %v2221_v10  ;;  %v842_v56 = vadd.f32 %v832_v11, %v2242_v13  ;;  %v843_v28 = vadd.f32 %v833_v27, %v2245_v16  ;;  %v1102_v40 = vld [vmem:[%s1404_s26 + $0xe8] sm:$0xff]  ;;  %v2534_v16 = vld [vmem:[#allocation23_spill] sm:$0xff] }
 0x1a2   : > { %800 = vst [vmem:[%s1404_s26 + $0x20] sm:$0xff] %v790_v54  ;;  %801 = vst [vmem:[%s1404_s26 + $0x28] sm:$0xff] %v791_v57  ;;  %v734_v37 = vadd.f32 %v724_v42, %v671_v35  ;;  %v735_v51 = vadd.f32 %v725_v43, %v672_v29  ;;  %v774_v13 = vadd.f32 %v2248_v0, %v2533_v1 }
 0x1a3   : > { %995 = vst [vmem:[%s1404_s26 + $0x70] sm:$0xff] %v840_v62  ;;  %996 = vst [vmem:[%s1404_s26 + $0x78] sm:$0xff] %v841_v7  ;;  %v775_v36 = vadd.f32 %v2251_v6, %v2534_v16  ;;  %v824_v5 = vadd.f32 %v814_v18, %v2533_v1  ;;  %v825_v8 = vadd.f32 %v815_v46, %v2534_v16 }
 0x1a4   : > { %802 = vst [vmem:[%s1404_s26 + $0x30] sm:$0xff] %v792_v30  ;;  %803 = vst [vmem:[%s1404_s26 + $0x38] sm:$0xff] %v793_v15  ;;  %v744_v39 = vsub.f32 %v734_v37, %v1101_v59  ;;  %v745_v10 = vsub.f32 %v735_v51, %v1102_v40 }
 0x1a5   : > { %997 = vst [vmem:[%s1404_s26 + $0x80] sm:$0xff] %v842_v56  ;;  %998 = vst [vmem:[%s1404_s26 + $0x88] sm:$0xff] %v843_v28 }
 0x1a6   : > { %v784_v60 = vmul.f32 -0.125, %v744_v39  ;;  %v785_v48 = vmul.f32 -0.125, %v745_v10  ;;  %v834_v61 = vmul.f32 -0.12, %v744_v39  ;;  %v835_v44 = vmul.f32 -0.12, %v745_v10 }
 0x1a8   : > { %v794_v0 = vadd.f32 %v784_v60, %v774_v13  ;;  %v795_v6 = vadd.f32 %v785_v48, %v775_v36  ;;  %v844_v23 = vadd.f32 %v834_v61, %v824_v5  ;;  %v845_v14 = vadd.f32 %v835_v44, %v825_v8 }
 0x1aa   : > { %804 = vst [vmem:[%s1404_s26 + $0x40] sm:$0xff] %v794_v0  ;;  %805 = vst [vmem:[%s1404_s26 + $0x48] sm:$0xff] %v795_v6 }
 0x1ab   : > { %999 = vst [vmem:[%s1404_s26 + $0x90] sm:$0xff] %v844_v23  ;;  %1000 = vst [vmem:[%s1404_s26 + $0x98] sm:$0xff] %v845_v14 }
 0x1ac   : > { %1170 = shalt.err (!%p1167_p12)
}
 0x1ad   : > { %s1171_s26 = scalar_lea.hbm %s2392_s17, 3840  ;;  %s1175_s19 = scalar_lea.hbm %s2449_s2, 7680 }
 0x1ae   : > { %p1172_p0 = scmp.ne.s32.totalorder %s2392_s17, %s1171_s26  ;;  %p1176_p10 = scmp.lt.s32.totalorder %s2392_s17, %s2449_s2 }
 0x1af   : > { %p1177_p11 = scmp.lt.s32.totalorder %s1175_s19, %s1171_s26 }
 0x1b0   : > { %p1173_p2 = pnand %p1172_p0, %p2535_p13 }
 0x1b1   : > { %p1178_p5 = por %p1177_p11, %p1176_p10 }
 0x1b2   : > { %p1174_p6 = pneg %p1173_p2 }
 0x1b4   : > { %p1179_p3 = pnand %p1178_p5, %p1174_p6 }
 0x1b6   : > { %1182 = shalt.err (!%p1179_p3)
}
 0x1b7   : > { %s1257_s3 = smov 256  }
 0x1b8   : > { %1015 = dma.vmem_to_hbm [thread:$0]  (%p2535_p13), %s2394_s12, 3840, %s2392_s17, %s858_s7, %s1257_s3, %s1257_s3, %s1252_s24  }
 0x1b9 PF: > { %s889_s4 = sand.u32 1, %s1221_s9   ;;  %p2536_p4 = scmp.ne.s32.totalorder %s2471_s22, 0 }
 0x1ba   : > { %p2537_p1 = scmp.ge.s32.totalorder %s1241_s14, 2  ;;  %s890_s6 = scalar_lea.sflag [#allocation4], %s889_s4 }
 0x1bc   : > { %p1026_p8 = pnand %p2537_p1, %p2536_p4 }
 0x1be   : > { %p1027_p7 = pneg %p1026_p8 }
 0x1c0   : > { %1216 = dma.done.wait (%p1027_p7), %s890_s6, 3840  }
 0x1c1   : > { %1218 = vsyncadd (%p1027_p7), %s890_s6, 4294963456  ;;  %s19_s14 = sadd.s32 1, %s1241_s14   ;;  %s2538_s9 = smov %s1225_s10 }
 0x1c2   : > { %p16_p9 = scmp.ge.s32.totalorder %s19_s14, 4   ;;  %s2539_s10 = smov %s1229_s11 }
 0x1c3   : > { %s2540_s11 = smov %s1375_s27  ;;  %s2541_s12 = smov %s1237_s13 }
 0x1c4   : > { %s2542_s13 = smov %s2544_s28  ;;  %18 = sbr.rel (!%p16_p9) target bundleno = 7 (0x7), region = 81 }
 0x1c9   :  { %895 = vsyncpa [#allocation3], 1 }
 0x1ca   :  { %897 = vsyncpa [#allocation3 + $0x1], 1 }
 0x1cb   :  { %898 = vsyncpa [#allocation6], 1 }
 0x1cc   :  { %900 = vsyncpa [#allocation6 + $0x1], 1 }
 0x1cd   :  { %901 = vsyncpa [#allocation4], 1 }
 0x1ce   :  { %903 = vsyncpa [#allocation4 + $0x1], 1 }

</bundles_post_ra>
